<compile_context>
chip_gen: v7x
topology: tpu7x:2x2x1
jax: 0.10.0
libtpu: 0.0.40
codegen_flags: <defaults>
</compile_context>

<pallas_src>
import functools

import jax
import jax.numpy as jnp
from jax.experimental import pallas as pl
from jax.experimental.pallas import tpu as pltpu


_SUBLANE = 16                    # bf16 sublane packing granularity
_LANES = 128                     # lane width
_VMEM_LIMIT = 32 * 1024 * 1024   # explicit scoped-VMEM limit (fits v7x's 64 MiB)


def _round_up(x, m):
    return (x + m - 1) // m * m


# ----------------------------------------------------------------------------
# Pallas kernels
# ----------------------------------------------------------------------------
def _conv_matmul_kernel(x_ref, w_ref, b_ref, o_ref, *, negative_slope, apply_act):
    """One M-tile of: out = leaky_relu(patches @ w + b).  bf16 in, f32 epilogue."""
    acc = jnp.dot(x_ref[...], w_ref[...], preferred_element_type=jnp.float32)
    acc = acc + b_ref[...]                       # (tm, Coutp) + (1, Coutp), f32
    if apply_act:
        acc = jnp.where(acc > 0, acc, acc * negative_slope)
    o_ref[...] = acc.astype(o_ref.dtype)


def _pool_matmul_kernel(p_ref, w_ref, b_ref, o_ref, acc_ref, *, inv_hw):
    """Last conv + global average pooling, fused.

    Grid axis 0 runs over HW chunks (reduction).  The per-image patch sum is
    accumulated in a VMEM f32 scratch; the final step applies 1/HW, does the
    tiny (N, K) @ (K, Coutp) matmul and adds the bias (no activation on the
    last layer, which is what makes this fusion exact)."""
    j = pl.program_id(0)

    @pl.when(j == 0)
    def _():
        acc_ref[...] = jnp.zeros_like(acc_ref)

    acc_ref[...] += jnp.sum(p_ref[...].astype(jnp.float32), axis=1)   # (N, K)

    @pl.when(j == pl.num_programs(0) - 1)
    def _():
        mean_p = acc_ref[...] * inv_hw                                 # (N, K) f32
        out = jnp.dot(mean_p, w_ref[...], preferred_element_type=jnp.float32)
        o_ref[...] = (out + b_ref[...]).astype(o_ref.dtype)


# ----------------------------------------------------------------------------
# Tile-size heuristics (trace-time Python, all static)
# ----------------------------------------------------------------------------
def _choose_tm(M, K, coutp, budget=20 << 20, max_tm=1024):
    """Largest M-tile fitting the VMEM budget; prefer an exact divisor of M."""
    def fits(t):
        # 2x double-buffered bf16 patch tiles + 2x f32 output tiles
        # + resident bf16 weight + f32 bias.
        return (2 * t * K * 2 + 2 * t * coutp * 4
                + K * coutp * 2 + coutp * 4) <= budget

    tm = min(max_tm, _round_up(M, _SUBLANE))
    while tm > _SUBLANE and not fits(tm):
        tm = _round_up(max(tm // 2, _SUBLANE), _SUBLANE)
    if M % _SUBLANE == 0:
        for cand in range(tm, max(tm // 2 - 1, 0), -_SUBLANE):
            if cand > 0 and M % cand == 0 and fits(cand):
                return cand
    return tm


def _choose_thw(HW, N, K, budget=16 << 20):
    """Spatial chunk for the fused pool kernel; returns (tile, padded_HW)."""
    def fits(t):
        return 2 * N * t * K * 2 <= budget       # double-buffered bf16 block
    if fits(HW):
        return HW, HW
    cap = _round_up(min(HW, 2048), _SUBLANE)
    for cand in range(cap, _SUBLANE - 1, -_SUBLANE):
        if HW % cand == 0 and fits(cand):
            return cand, HW
    t = _SUBLANE
    while fits(t * 2) and t * 2 <= HW:
        t *= 2
    return t, _round_up(HW, t)


# ----------------------------------------------------------------------------
# Glue: transpose-free im2col (pure JAX slices, fused by XLA)
# ----------------------------------------------------------------------------
def _im2col(x_nhwc, k, s):
    """Returns patches of shape (N, Ho*Wo, k*k*Cin), K ordered (kh, kw, ci)."""
    N, H, W, Cin = x_nhwc.shape
    p = k // 2
    xp = jnp.pad(x_nhwc, ((0, 0), (p, p), (p, p), (0, 0)))
    Ho = (H + 2 * p - k) // s + 1
    Wo = (W + 2 * p - k) // s + 1
    cols = []
    for kh in range(k):
        for kw in range(k):
            sl = xp[:, kh:kh + (Ho - 1) * s + 1:s, kw:kw + (Wo - 1) * s + 1:s, :]
            cols.append(sl)                                  # (N, Ho, Wo, Cin)
    patches = jnp.stack(cols, axis=3)                        # (N, Ho, Wo, k*k, Cin)
    return patches.reshape(N, Ho * Wo, k * k * Cin), Ho, Wo


def _prep_weight(w, b, coutp, dtype):
    """(Cout, Cin, k, k) -> (K, Coutp) matching (kh, kw, ci)-major patches."""
    cout, cin, k, _ = w.shape
    w_mat = jnp.transpose(w, (2, 3, 1, 0)).reshape(k * k * cin, cout)
    w_mat = jnp.pad(w_mat, ((0, 0), (0, coutp - cout))).astype(dtype)
    bias = jnp.pad(b, (0, coutp - cout)).reshape(1, coutp).astype(jnp.float32)
    return w_mat, bias


# ----------------------------------------------------------------------------
# Layer wrappers around pallas_call
# ----------------------------------------------------------------------------
def _conv_layer(x_nhwc, w, b, k, s, negative_slope):
    """conv + bias + LeakyReLU (non-final layers)."""
    N, H, W_, Cin = x_nhwc.shape
    Cout = w.shape[0]
    Coutp = _round_up(Cout, _LANES)
    K = Cin * k * k

    patches3, Ho, Wo = _im2col(x_nhwc, k, s)
    M = N * Ho * Wo
    patches = patches3.reshape(M, K).astype(jnp.bfloat16)
    w_mat, bias = _prep_weight(w, b, Coutp, jnp.bfloat16)

    tm = _choose_tm(M, K, Coutp)
    Mp = _round_up(M, tm)
    if Mp != M:
        # Fused by XLA into the (pad+stack+reshape+cast) patch-building fusion.
        patches = jnp.pad(patches, ((0, Mp - M), (0, 0)))

    kernel = functools.partial(
        _conv_matmul_kernel, negative_slope=negative_slope, apply_act=True
    )
    out = pl.pallas_call(
        kernel,
        out_shape=jax.ShapeDtypeStruct((Mp, Coutp), jnp.float32),
        grid=(Mp // tm,),
        in_specs=[
            pl.BlockSpec((tm, K), lambda i: (i, 0)),       # patches tile (bf16)
            pl.BlockSpec((K, Coutp), lambda i: (0, 0)),    # resident weight
            pl.BlockSpec((1, Coutp), lambda i: (0, 0)),    # bias row (f32)
        ],
        out_specs=pl.BlockSpec((tm, Coutp), lambda i: (i, 0)),  # lane-dense out
        compiler_params=pltpu.CompilerParams(
            dimension_semantics=("parallel",),
            vmem_limit_bytes=_VMEM_LIMIT,
        ),
    )(patches, w_mat, bias)
    out = out[:M, :Cout]
    return out.reshape(N, Ho, Wo, Cout)


def _last_conv_pool(x_nhwc, w, b, k, s):
    """Final conv (no activation) fused with global average pooling."""
    N, H, W_, Cin = x_nhwc.shape
    Cout = w.shape[0]
    Coutp = _round_up(Cout, _LANES)
    K = Cin * k * k

    patches3, Ho, Wo = _im2col(x_nhwc, k, s)
    HW = Ho * Wo
    patches3 = patches3.astype(jnp.bfloat16)
    # Keep the tiny final matmul in f32 (weight is only K*Coutp*4 bytes).
    w_mat, bias = _prep_weight(w, b, Coutp, jnp.float32)

    t_hw, HWp = _choose_thw(HW, N, K)
    if HWp != HW:
        patches3 = jnp.pad(patches3, ((0, 0), (0, HWp - HW), (0, 0)))  # zeros: sum-safe

    kernel = functools.partial(_pool_matmul_kernel, inv_hw=1.0 / float(HW))
    out = pl.pallas_call(
        kernel,
        out_shape=jax.ShapeDtypeStruct((N, Coutp), jnp.float32),
        grid=(HWp // t_hw,),
        in_specs=[
            pl.BlockSpec((N, t_hw, K), lambda j: (0, j, 0)),   # patches chunk
            pl.BlockSpec((K, Coutp), lambda j: (0, 0)),        # resident weight
            pl.BlockSpec((1, Coutp), lambda j: (0, 0)),        # bias row
        ],
        out_specs=pl.BlockSpec((N, Coutp), lambda j: (0, 0)),
        scratch_shapes=[pltpu.VMEM((N, K), jnp.float32)],      # running patch sum
        compiler_params=pltpu.CompilerParams(
            dimension_semantics=("arbitrary",),                 # reduction axis
            vmem_limit_bytes=_VMEM_LIMIT,
        ),
    )(patches3, w_mat, bias)
    return out[:, :Cout]                                        # (N, Cout)


def _forward_impl(x_nchw, params, kernel_sizes, strides, negative_slope):
    x = jnp.transpose(x_nchw, (0, 2, 3, 1))  # NCHW -> NHWC
    n = len(params)
    for i in range(n - 1):
        w, b = params[i]
        x = _conv_layer(x, w, b, kernel_sizes[i], strides[i], negative_slope)
    w, b = params[-1]
    return _last_conv_pool(x, w, b, kernel_sizes[-1], strides[-1])   # (N, Cout)


_forward = jax.jit(_forward_impl, static_argnums=(2, 3, 4))


# ----------------------------------------------------------------------------
# CNN2D module (deterministic synthetic params, PyTorch-equivalent forward)
# ----------------------------------------------------------------------------
class CNN2DPallas:
    def __init__(self, input_channel, convs, kernel_sizes, strides, key):
        assert len(convs) == len(kernel_sizes) == len(strides)
        self.input_channel = input_channel
        self.convs = convs
        self.kernel_sizes = tuple(kernel_sizes)
        self.strides = tuple(strides)
        self.negative_slope = 0.01  # nn.LeakyReLU default

        self.params = []
        cin = input_channel
        for cout, k, _ in zip(convs, kernel_sizes, strides):
            key, wk, bk = jax.random.split(key, 3)
            fan_in = cin * k * k
            bound = 1.0 / float(fan_in) ** 0.5
            w = jax.random.uniform(wk, (cout, cin, k, k), jnp.float32, -bound, bound)
            b = jax.random.uniform(bk, (cout,), jnp.float32, -bound, bound)
            self.params.append((w, b))
            cin = cout

    def __call__(self, x):
        # x: (N, Cin, H, W) or (Cin, H, W), float32 (PyTorch NCHW convention)
        squeeze = x.ndim == 3
        if squeeze:
            x = x[None]
        assert x.ndim == 4
        pooled = _forward(x, self.params, self.kernel_sizes, self.strides,
                          self.negative_slope)
        if squeeze:
            pooled = pooled[0]
        return pooled


# ----------------------------------------------------------------------------
# Pure-JAX reference (sanity check only)
# ----------------------------------------------------------------------------
def _reference(x_nchw, params, kernel_sizes, strides, negative_slope=0.01):
    x = x_nchw
    n = len(params)
    for i, ((w, b), k, s) in enumerate(zip(params, kernel_sizes, strides)):
        p = k // 2
        x = jax.lax.conv_general_dilated(
            x, w, (s, s), ((p, p), (p, p)),
            dimension_numbers=("NCHW", "OIHW", "NCHW"),
        )
        x = x + b[None, :, None, None]
        if i < n - 1:
            x = jnp.where(x > 0, x, x * negative_slope)
    return jnp.mean(x.reshape(x.shape[0], x.shape[1], -1), axis=2)


if __name__ == "__main__":
    key = jax.random.PRNGKey(0)
    key, xk, pk = jax.random.split(key, 3)

    # Small shapes consistent with the module's forward:
    batch, cin, H, W = 2, 4, 16, 16
    convs = [8, 16]
    kernel_sizes = [3, 3]
    strides = [2, 1]

    x = jax.random.normal(xk, (batch, cin, H, W), jnp.float32)  # NCHW, like PyTorch

    model = CNN2DPallas(cin, convs, kernel_sizes, strides, pk)
    out = model(x)
    out = jax.block_until_ready(out)
    assert out.shape == (batch, convs[-1]), out.shape

    ref = jax.block_until_ready(
        _reference(x, model.params, kernel_sizes, strides, model.negative_slope)
    )
    assert jnp.allclose(out, ref, atol=2e-2, rtol=2e-2), (out, ref)

    print("KERNEL_OK")
</pallas_src>

<mosaic_0001>
module attributes {stable_mosaic.version = 11 : i64} {
  func.func @_conv_matmul_kernel(%arg0: i32, %arg1: memref<128x36xbf16, #tpu.memory_space<vmem>>, %arg2: memref<36x128xbf16, #tpu.memory_space<vmem>>, %arg3: memref<1x128xf32, #tpu.memory_space<vmem>>, %arg4: memref<128x128xf32, #tpu.memory_space<vmem>>) attributes {dimension_semantics = [#tpu.dimension_semantics<parallel>], iteration_bounds = array<i64: 1>, scalar_prefetch = 0 : i64, scratch_operands = 0 : i64, tpu.core_type = #tpu.core_type<tc>, window_params = [{transform_indices = @transform_0, window_bounds = array<i64: 128, 36>}, {pipeline_mode = #tpu.pipeline_mode<synchronous>, transform_indices = @transform_1, window_bounds = array<i64: 36, 128>}, {pipeline_mode = #tpu.pipeline_mode<synchronous>, transform_indices = @transform_2, window_bounds = array<i64: 1, 128>}, {transform_indices = @transform_3, window_bounds = array<i64: 128, 128>}]} {
    %c0 = arith.constant 0 : index
    %c0_0 = arith.constant 0 : index
    %0 = vector.load %arg1[%c0, %c0_0] : memref<128x36xbf16, #tpu.memory_space<vmem>>, vector<128x36xbf16>
    %c0_1 = arith.constant 0 : index
    %c0_2 = arith.constant 0 : index
    %1 = vector.load %arg2[%c0_1, %c0_2] : memref<36x128xbf16, #tpu.memory_space<vmem>>, vector<36x128xbf16>
    %cst = arith.constant dense<0.000000e+00> : vector<128x128xf32>
    %2 = tpu.matmul %0, %1, %cst {dimension_numbers = #tpu.dot_dimension_numbers<[1], [0], [0], [1], [0, 0, 1, 1], [], []>} : vector<128x36xbf16>, vector<36x128xbf16>, vector<128x128xf32> -> vector<128x128xf32>
    %c0_3 = arith.constant 0 : index
    %c0_4 = arith.constant 0 : index
    %3 = vector.load %arg3[%c0_3, %c0_4] : memref<1x128xf32, #tpu.memory_space<vmem>>, vector<1x128xf32>
    %4 = vector.broadcast %3 : vector<1x128xf32> to vector<128x128xf32>
    %5 = arith.addf %2, %4 : vector<128x128xf32>
    %cst_5 = arith.constant 0.000000e+00 : f32
    %6 = vector.broadcast %cst_5 : f32 to vector<128x128xf32>
    %7 = arith.cmpf ogt, %5, %6 : vector<128x128xf32>
    %cst_6 = arith.constant 0.00999999977 : f32
    %8 = vector.broadcast %cst_6 : f32 to vector<128x128xf32>
    %9 = arith.mulf %5, %8 : vector<128x128xf32>
    %10 = arith.select %7, %5, %9 : vector<128x128xi1>, vector<128x128xf32>
    %c0_7 = arith.constant 0 : index
    %c0_8 = arith.constant 0 : index
    %11 = vector.load %arg4[%c0_7, %c0_8] : memref<128x128xf32, #tpu.memory_space<vmem>>, vector<128x128xf32>
    tpu.vector_store %arg4[%c0_7, %c0_8], %10 {strides = array<i32>} : memref<128x128xf32, #tpu.memory_space<vmem>>, vector<128x128xf32>,
    return
  }
  func.func @transform_0(%arg0: i32) -> (i32, i32) {
    %c0_i32 = arith.constant 0 : i32
    %c0_i32_0 = arith.constant 0 : i32
    return %arg0, %c0_i32 : i32, i32
  }
  func.func @transform_1(%arg0: i32) -> (i32, i32) {
    %c0_i32 = arith.constant 0 : i32
    %c0_i32_0 = arith.constant 0 : i32
    %c0_i32_1 = arith.constant 0 : i32
    return %c0_i32, %c0_i32_0 : i32, i32
  }
  func.func @transform_2(%arg0: i32) -> (i32, i32) {
    %c0_i32 = arith.constant 0 : i32
    %c0_i32_0 = arith.constant 0 : i32
    %c0_i32_1 = arith.constant 0 : i32
    return %c0_i32, %c0_i32_0 : i32, i32
  }
  func.func @transform_3(%arg0: i32) -> (i32, i32) {
    %c0_i32 = arith.constant 0 : i32
    %c0_i32_0 = arith.constant 0 : i32
    return %arg0, %c0_i32 : i32, i32
  }
}

module attributes {stable_mosaic.version = 11 : i64} {
  func.func @_pool_matmul_kernel(%arg0: i32, %arg1: memref<2x64x72xbf16, #tpu.memory_space<vmem>>, %arg2: memref<72x128xf32, #tpu.memory_space<vmem>>, %arg3: memref<1x128xf32, #tpu.memory_space<vmem>>, %arg4: memref<2x128xf32, #tpu.memory_space<vmem>>, %arg5: memref<2x72xf32, #tpu.memory_space<vmem>>) attributes {dimension_semantics = [#tpu.dimension_semantics<arbitrary>], iteration_bounds = array<i64: 1>, scalar_prefetch = 0 : i64, scratch_operands = 1 : i64, tpu.core_type = #tpu.core_type<tc>, window_params = [{transform_indices = @transform_0, window_bounds = array<i64: 2, 64, 72>}, {pipeline_mode = #tpu.pipeline_mode<synchronous>, transform_indices = @transform_1, window_bounds = array<i64: 72, 128>}, {pipeline_mode = #tpu.pipeline_mode<synchronous>, transform_indices = @transform_2, window_bounds = array<i64: 1, 128>}, {pipeline_mode = #tpu.pipeline_mode<synchronous>, transform_indices = @transform_3, window_bounds = array<i64: 2, 128>}]} {
    %c0_i32 = arith.constant 0 : i32
    %0 = arith.cmpi eq, %arg0, %c0_i32 : i32
    %1 = arith.extui %0 : i1 to i32
    %c0_i32_0 = arith.constant 0 : i32
    %2 = arith.cmpi ne, %1, %c0_i32_0 : i32
    scf.if %2 {
      %cst_9 = arith.constant 0.000000e+00 : f32
      %12 = vector.broadcast %cst_9 : f32 to vector<2x72xf32>
      %c0_10 = arith.constant 0 : index
      %c0_11 = arith.constant 0 : index
      %13 = vector.load %arg5[%c0_10, %c0_11] : memref<2x72xf32, #tpu.memory_space<vmem>>, vector<2x72xf32>
      tpu.vector_store %arg5[%c0_10, %c0_11], %12 {strides = array<i32>} : memref<2x72xf32, #tpu.memory_space<vmem>>, vector<2x72xf32>,
    } else {
    }
    %c0 = arith.constant 0 : index
    %c0_1 = arith.constant 0 : index
    %3 = vector.load %arg5[%c0, %c0_1] : memref<2x72xf32, #tpu.memory_space<vmem>>, vector<2x72xf32>
    %c0_2 = arith.constant 0 : index
    %c0_3 = arith.constant 0 : index
    %c0_4 = arith.constant 0 : index
    %4 = vector.load %arg1[%c0_2, %c0_3, %c0_4] : memref<2x64x72xbf16, #tpu.memory_space<vmem>>, vector<2x64x72xbf16>
    %5 = arith.extf %4 : vector<2x64x72xbf16> to vector<2x64x72xf32>
    %cst = arith.constant dense<0.000000e+00> : vector<2x72xf32>
    %6 = vector.multi_reduction <add>, %5, %cst [1] : vector<2x64x72xf32> to vector<2x72xf32>
    %7 = arith.addf %3, %6 : vector<2x72xf32>
    %c0_5 = arith.constant 0 : index
    %c0_6 = arith.constant 0 : index
    %8 = vector.load %arg5[%c0_5, %c0_6] : memref<2x72xf32, #tpu.memory_space<vmem>>, vector<2x72xf32>
    tpu.vector_store %arg5[%c0_5, %c0_6], %7 {strides = array<i32>} : memref<2x72xf32, #tpu.memory_space<vmem>>, vector<2x72xf32>,
    %c0_i32_7 = arith.constant 0 : i32
    %9 = arith.cmpi eq, %arg0, %c0_i32_7 : i32
    %10 = arith.extui %9 : i1 to i32
    %c0_i32_8 = arith.constant 0 : i32
    %11 = arith.cmpi ne, %10, %c0_i32_8 : i32
    scf.if %11 {
      %c0_9 = arith.constant 0 : index
      %c0_10 = arith.constant 0 : index
      %12 = vector.load %arg5[%c0_9, %c0_10] : memref<2x72xf32, #tpu.memory_space<vmem>>, vector<2x72xf32>
      %cst_11 = arith.constant 1.562500e-02 : f32
      %13 = vector.broadcast %cst_11 : f32 to vector<2x72xf32>
      %14 = arith.mulf %12, %13 : vector<2x72xf32>
      %c0_12 = arith.constant 0 : index
      %c0_13 = arith.constant 0 : index
      %15 = vector.load %arg2[%c0_12, %c0_13] : memref<72x128xf32, #tpu.memory_space<vmem>>, vector<72x128xf32>
      %cst_14 = arith.constant dense<0.000000e+00> : vector<2x128xf32>
      %16 = tpu.matmul %14, %15, %cst_14 {dimension_numbers = #tpu.dot_dimension_numbers<[1], [0], [0], [1], [0, 0, 1, 1], [], []>} : vector<2x72xf32>, vector<72x128xf32>, vector<2x128xf32> -> vector<2x128xf32>
      %c0_15 = arith.constant 0 : index
      %c0_16 = arith.constant 0 : index
      %17 = vector.load %arg3[%c0_15, %c0_16] : memref<1x128xf32, #tpu.memory_space<vmem>>, vector<1x128xf32>
      %18 = vector.broadcast %17 : vector<1x128xf32> to vector<2x128xf32>
      %19 = arith.addf %16, %18 : vector<2x128xf32>
      %c0_17 = arith.constant 0 : index
      %c0_18 = arith.constant 0 : index
      %20 = vector.load %arg4[%c0_17, %c0_18] : memref<2x128xf32, #tpu.memory_space<vmem>>, vector<2x128xf32>
      tpu.vector_store %arg4[%c0_17, %c0_18], %19 {strides = array<i32>} : memref<2x128xf32, #tpu.memory_space<vmem>>, vector<2x128xf32>,
    } else {
    }
    return
  }
  func.func @transform_0(%arg0: i32) -> (i32, i32, i32) {
    %c0_i32 = arith.constant 0 : i32
    %c0_i32_0 = arith.constant 0 : i32
    %c0_i32_1 = arith.constant 0 : i32
    return %c0_i32, %arg0, %c0_i32_0 : i32, i32, i32
  }
  func.func @transform_1(%arg0: i32) -> (i32, i32) {
    %c0_i32 = arith.constant 0 : i32
    %c0_i32_0 = arith.constant 0 : i32
    %c0_i32_1 = arith.constant 0 : i32
    return %c0_i32, %c0_i32_0 : i32, i32
  }
  func.func @transform_2(%arg0: i32) -> (i32, i32) {
    %c0_i32 = arith.constant 0 : i32
    %c0_i32_0 = arith.constant 0 : i32
    %c0_i32_1 = arith.constant 0 : i32
    return %c0_i32, %c0_i32_0 : i32, i32
  }
  func.func @transform_3(%arg0: i32) -> (i32, i32) {
    %c0_i32 = arith.constant 0 : i32
    %c0_i32_0 = arith.constant 0 : i32
    %c0_i32_1 = arith.constant 0 : i32
    return %c0_i32, %c0_i32_0 : i32, i32
  }
}

</mosaic_0001>

<bundles_post_ra>
// kernel: _forward_impl.2
= control target key start
LH: loop header
LB: loop body
LE: loop exit
PB: predicated region body
PF: predicated region fallthrough
CT: control target
= control target key end

     0   :  { %vm98_vm0 = vcmask 293888   ;;  %vm123_vm1 = vcmask 1041408   ;;  %s494_s1 = inlined_call_operand.vmem [shape: bf16[36,128], index: 1, kind: input, shape index: {}]   ;;  %s495_s0 = inlined_call_operand.vmem [shape: bf16[128,36], index: 0, kind: input, shape index: {}]   ;;  %s496_s2 = inlined_call_operand.vmem [shape: f32[1,128], index: 2, kind: input, shape index: {}]   ;;  %s497_s3 = inlined_call_operand.vmem [shape: f32[128,128], index: 3, kind: output, shape index: {}]  }
   0x1   :  { %v353_v0 = vld [vmem:[%s494_s1] sm:$0xff]   ;;  %v354_v1 = vld [vmem:[%s494_s1 + $0x8] sm:$0xff]   ;;  %v355_v2 = vld [vmem:[%s494_s1 + $0x10] ss:$0 sps:$4 sm:$0x33]  }
   0x2   :  { %323 = vmatprep.subr.bf16.mxu0 %v353_v0  ;;  %345 = vmatprep.subr.bf16.mxu1 %v353_v0  ;;  %v356_v3 = vld [vmem:[%s495_s0] sm:$0xff]   ;;  %v125_v5 = vsel %vm123_vm1, %v355_v2, 0  ;;  %v358_v6 = vld [vmem:[%s495_s0 + $0x8] sm:$0xff]   ;;  %v360_v8 = vld [vmem:[%s495_s0 + $0x10] sm:$0xff]  }
   0x3   :  { %324 = vmatpush3.bf16.msra.mxu0 %v353_v0  ;;  %348 = vmatpush3.bf16.msra.mxu1 %v353_v0  ;;  %v357_v4 = vld [vmem:[%s495_s0 + $0x20] sm:$0xff]   ;;  %v359_v7 = vld [vmem:[%s495_s0 + $0x28] sm:$0xff]   ;;  %v361_v9 = vld [vmem:[%s495_s0 + $0x30] sm:$0xff]  }
   0x4   :  { %325 = vmatprep.subr.bf16.mxu0 %v354_v1  ;;  %346 = vmatprep.subr.bf16.mxu1 %v354_v1  ;;  %v362_v10 = vld [vmem:[%s495_s0 + $0x18] sm:$0xff]   ;;  %v428_v12 = vld [vmem:[%s496_s2] ss:$0 sm:$0xff] }
   0x5   :  { %329 = vmatprep.mubr.msk.bf16.mxu0 %vm98_vm0, %v356_v3  ;;  %337 = vmatprep.mubr.msk.bf16.mxu1 %vm98_vm0, %v357_v4  ;;  %v363_v11 = vld [vmem:[%s495_s0 + $0x38] sm:$0xff]  }
   0x7   :  { %326 = vmatpush3.bf16.msra.mxu0 %v354_v1  ;;  %349 = vmatpush3.bf16.msra.mxu1 %v354_v1 }
   0x8   :  { %351 = vmatprep.subr.msk.bf16.mxu0 %vm123_vm1, %v355_v2  ;;  %352 = vmatprep.subr.msk.bf16.mxu1 %vm123_vm1, %v355_v2 }
   0xb   :  { %328 = vmatpush3.bf16.msra.mxu0 %v125_v5  ;;  %350 = vmatpush3.bf16.msra.mxu1 %v125_v5 }
   0xe   :  { %330 = vmatmul.mubr.msk.bf16.vlgmr.msra.gmra.mrb[0].mxu0 %vm98_vm0, %v358_v6  ;;  %338 = vmatmul.mubr.msk.bf16.vlgmr.msra.gmra.mrb[0].mxu1 %vm98_vm0, %v359_v7 }
   0xf   :  { %333 = vmatprep.mubr.msk.bf16.mxu0 %vm98_vm0, %v360_v8  ;;  %341 = vmatprep.mubr.msk.bf16.mxu1 %vm98_vm0, %v361_v9 }
  0x16   :  { %334 = vmatmul.mubr.msk.bf16.gmra.mrb[4].mxu0 %vm98_vm0, %v362_v10  ;;  %342 = vmatmul.mubr.msk.bf16.gmra.mrb[4].mxu1 %vm98_vm0, %v363_v11 }
  0xe1   :  { %v331_v13 = vpop.f32.mrb[0].mxu0  ;;  %v339_v14 = vpop.f32.mrb[0].mxu1 }
  0xe2   :  { %v170_v15 = vadd.f32 %v331_v13, %v428_v12  ;;  %v202_v16 = vadd.f32 %v339_v14, %v428_v12  ;;  %v161_v17 = vpop.f32.mrb[1].mxu0  ;;  %v193_v18 = vpop.f32.mrb[1].mxu1 }
  0xe3   :  { %v162_v19 = vadd.f32 %v428_v12, %v161_v17  ;;  %v194_v20 = vadd.f32 %v428_v12, %v193_v18  ;;  %v332_v21 = vpop.f32.mrb[2].mxu0  ;;  %v340_v22 = vpop.f32.mrb[2].mxu1 }
  0xe4   :  { %vm226_vm2 = vcmp.gt.f32.partialorder %v170_v15, 0.0  ;;  %v242_v23 = vmul.f32 0.01, %v170_v15  ;;  %vm234_vm3 = vcmp.gt.f32.partialorder %v202_v16, 0.0  ;;  %v250_v24 = vmul.f32 0.01, %v202_v16 }
  0xe5   :  { %vm224_vm4 = vcmp.gt.f32.partialorder %v162_v19, 0.0  ;;  %v240_v25 = vmul.f32 0.01, %v162_v19  ;;  %vm232_vm5 = vcmp.gt.f32.partialorder %v194_v20, 0.0  ;;  %v248_v26 = vmul.f32 0.01, %v194_v20 }
  0xe6   :  { %v258_v27 = vsel %vm226_vm2, %v170_v15, %v242_v23  ;;  %v266_v28 = vsel %vm234_vm3, %v202_v16, %v250_v24  ;;  %v173_v29 = vadd.f32 %v332_v21, %v428_v12  ;;  %v205_v30 = vadd.f32 %v340_v22, %v428_v12  ;;  %v164_v31 = vpop.f32.mrb[3].mxu0  ;;  %v196_v32 = vpop.f32.mrb[3].mxu1 }
  0xe7   :  { %274 = vst [vmem:[%s497_s3 + $0x10] sm:$0xff] %v258_v27  ;;  %282 = vst [vmem:[%s497_s3 + $0x50] sm:$0xff] %v266_v28  ;;  %v256_v33 = vsel %vm224_vm4, %v162_v19, %v240_v25  ;;  %v264_v34 = vsel %vm232_vm5, %v194_v20, %v248_v26  ;;  %v165_v35 = vadd.f32 %v428_v12, %v164_v31 }
  0xe8   :  { %v197_v36 = vadd.f32 %v428_v12, %v196_v32  ;;  %272 = vst [vmem:[%s497_s3] sm:$0xff] %v256_v33  ;;  %280 = vst [vmem:[%s497_s3 + $0x40] sm:$0xff] %v264_v34  ;;  %vm227_vm6 = vcmp.gt.f32.partialorder %v173_v29, 0.0  ;;  %v243_v37 = vmul.f32 0.01, %v173_v29  ;;  %vm235_vm7 = vcmp.gt.f32.partialorder %v205_v30, 0.0 }
  0xe9   :  { %v251_v38 = vmul.f32 0.01, %v205_v30  ;;  %vm225_vm8 = vcmp.gt.f32.partialorder %v165_v35, 0.0  ;;  %v241_v39 = vmul.f32 0.01, %v165_v35  ;;  %v335_v43 = vpop.f32.mrb[4].mxu0 }
  0xea   :  { %vm233_vm9 = vcmp.gt.f32.partialorder %v197_v36, 0.0  ;;  %v249_v40 = vmul.f32 0.01, %v197_v36  ;;  %v259_v41 = vsel %vm227_vm6, %v173_v29, %v243_v37  ;;  %v343_v44 = vpop.f32.mrb[4].mxu1  ;;  %v186_v47 = vadd.f32 %v335_v43, %v428_v12  ;;  %v177_v49 = vpop.f32.mrb[5].mxu0 }
  0xeb   :  { %v267_v42 = vsel %vm235_vm7, %v205_v30, %v251_v38  ;;  %275 = vst [vmem:[%s497_s3 + $0x18] sm:$0xff] %v259_v41  ;;  %v257_v45 = vsel %vm225_vm8, %v165_v35, %v241_v39  ;;  %v218_v48 = vadd.f32 %v343_v44, %v428_v12  ;;  %v209_v50 = vpop.f32.mrb[5].mxu1  ;;  %v178_v51 = vadd.f32 %v428_v12, %v177_v49  ;;  %v336_v53 = vpop.f32.mrb[6].mxu0 }
  0xec   :  { %283 = vst [vmem:[%s497_s3 + $0x58] sm:$0xff] %v267_v42  ;;  %v265_v46 = vsel %vm233_vm9, %v197_v36, %v249_v40  ;;  %273 = vst [vmem:[%s497_s3 + $0x8] sm:$0xff] %v257_v45  ;;  %v210_v52 = vadd.f32 %v428_v12, %v209_v50  ;;  %v344_v54 = vpop.f32.mrb[6].mxu1  ;;  %vm230_vm10 = vcmp.gt.f32.partialorder %v186_v47, 0.0  ;;  %v246_v55 = vmul.f32 0.01, %v186_v47 }
  0xed   :  { %281 = vst [vmem:[%s497_s3 + $0x48] sm:$0xff] %v265_v46  ;;  %vm238_vm11 = vcmp.gt.f32.partialorder %v218_v48, 0.0  ;;  %v254_v56 = vmul.f32 0.01, %v218_v48  ;;  %vm228_vm12 = vcmp.gt.f32.partialorder %v178_v51, 0.0  ;;  %v189_v61 = vadd.f32 %v336_v53, %v428_v12  ;;  %v180_v63 = vpop.f32.mrb[7].mxu0 }
  0xee   :  { %v244_v57 = vmul.f32 0.01, %v178_v51  ;;  %vm236_vm13 = vcmp.gt.f32.partialorder %v210_v52, 0.0  ;;  %v252_v58 = vmul.f32 0.01, %v210_v52  ;;  %v262_v59 = vsel %vm230_vm10, %v186_v47, %v246_v55  ;;  %v212_v0 = vpop.f32.mrb[7].mxu1 }
  0xef   :  { %v270_v60 = vsel %vm238_vm11, %v218_v48, %v254_v56  ;;  %v221_v62 = vadd.f32 %v344_v54, %v428_v12  ;;  %278 = vst [vmem:[%s497_s3 + $0x30] sm:$0xff] %v262_v59  ;;  %v181_v3 = vadd.f32 %v428_v12, %v180_v63  ;;  %v213_v4 = vadd.f32 %v428_v12, %v212_v0 }
  0xf0   :  { %286 = vst [vmem:[%s497_s3 + $0x70] sm:$0xff] %v270_v60  ;;  %v260_v1 = vsel %vm228_vm12, %v178_v51, %v244_v57  ;;  %v268_v2 = vsel %vm236_vm13, %v210_v52, %v252_v58  ;;  %vm231_vm14 = vcmp.gt.f32.partialorder %v189_v61, 0.0  ;;  %v247_v5 = vmul.f32 0.01, %v189_v61 }
  0xf1   :  { %276 = vst [vmem:[%s497_s3 + $0x20] sm:$0xff] %v260_v1  ;;  %284 = vst [vmem:[%s497_s3 + $0x60] sm:$0xff] %v268_v2  ;;  %vm239_vm15 = vcmp.gt.f32.partialorder %v221_v62, 0.0  ;;  %v255_v6 = vmul.f32 0.01, %v221_v62  ;;  %vm229_vm0 = vcmp.gt.f32.partialorder %v181_v3, 0.0 }
  0xf2   :  { %v245_v7 = vmul.f32 0.01, %v181_v3  ;;  %vm237_vm1 = vcmp.gt.f32.partialorder %v213_v4, 0.0  ;;  %v253_v8 = vmul.f32 0.01, %v213_v4  ;;  %v263_v9 = vsel %vm231_vm14, %v189_v61, %v247_v5 }
  0xf3   :  { %v271_v10 = vsel %vm239_vm15, %v221_v62, %v255_v6  ;;  %279 = vst [vmem:[%s497_s3 + $0x38] sm:$0xff] %v263_v9 }
  0xf4   :  { %287 = vst [vmem:[%s497_s3 + $0x78] sm:$0xff] %v271_v10  ;;  %v261_v11 = vsel %vm229_vm0, %v181_v3, %v245_v7  ;;  %v269_v12 = vsel %vm237_vm1, %v213_v4, %v253_v8 }
  0xf5   :  { %277 = vst [vmem:[%s497_s3 + $0x28] sm:$0xff] %v261_v11  ;;  %285 = vst [vmem:[%s497_s3 + $0x68] sm:$0xff] %v269_v12 }

// kernel: _forward_impl.3
= control target key start
LH: loop header
LB: loop body
LE: loop exit
PB: predicated region body
PF: predicated region fallthrough
CT: control target
= control target key end

     0   :  { %vm19_vm0 = vcmask 582656   ;;  %v326_v3 = vmov 0.0|0.0   ;;  %v327_v6 = vmov 0.0   ;;  %vm328_vm1 = vmmov 0   ;;  %s438_s0 = inlined_call_operand.vmem [shape: bf16[2,64,72], index: 0, kind: input, shape index: {}]   ;;  %s439_s1 = inlined_call_operand.vmem [shape: f32[72,128], index: 1, kind: input, shape index: {}]   ;;  %s440_s2 = inlined_call_operand.vmem [shape: f32[1,128], index: 2, kind: input, shape index: {}]   ;;  %s441_s3 = inlined_call_operand.hbm [shape: f32[2,128], index: 3, kind: output, shape index: {}]  }
   0x1   :  { %v110_v0 = vld [vmem:[%s439_s1] sm:$0xff]  ;;  %v111_v1 = vld [vmem:[%s439_s1 + $0x8] sm:$0xff]  ;;  %v112_v2 = vld [vmem:[%s439_s1 + $0x10] sm:$0xff]  ;;  %286 = vmatprep.subr.bf16.mxu0 %v326_v3  ;;  %20 = vst.msk [vmem:[#allocation2] sm:$0x3] %vm19_vm0, %v327_v6  ;;  %283 = vmatprep.mubr.msk.f32.mxu0 %vm328_vm1, %v327_v6  ;;  %vm54_vm2 = vcmask 588800  }
   0x2   :  { %v287_v4 = vpack.c.bf16 %v111_v1, %v110_v0  ;;  %v113_v5 = vld [vmem:[%s439_s1 + $0x18] sm:$0xff]  ;;  %v217_v7 = vld [vmem:[%s438_s0] sm:$0xff]   ;;  %v115_v10 = vld [vmem:[%s439_s1 + $0x28] sm:$0xff] }
   0x3   :  { %v290_v8 = vpack.c.bf16 %v113_v5, %v112_v2  ;;  %v114_v9 = vld [vmem:[%s439_s1 + $0x20] sm:$0xff]  ;;  %v218_v11 = vunpack.c.l.bf16 %v217_v7  ;;  %v219_v12 = vunpack.c.h.bf16 %v217_v7  ;;  %v248_v13 = vld [vmem:[%s438_s0 + $0x8] sm:$0xff]   ;;  %v249_v15 = vld [vmem:[%s438_s0 + $0x10] sm:$0xff]  }
   0x4   :  { %288 = vmatpush3.bf16.msra.mxu0 %v287_v4  ;;  %v222_v14 = vunpack.c.l.bf16 %v248_v13  ;;  %v251_v16 = vld [vmem:[%s438_s0 + $0x20] sm:$0xff]   ;;  %v252_v17 = vld [vmem:[%s438_s0 + $0x28] sm:$0xff]   ;;  %v223_v18 = vunpack.c.h.bf16 %v248_v13 }
   0x5   :  { %289 = vmatprep.subr.bf16.mxu0 %v326_v3  ;;  %v234_v19 = vunpack.c.l.bf16 %v251_v16  ;;  %v235_v20 = vunpack.c.h.bf16 %v251_v16  ;;  %v238_v21 = vunpack.c.l.bf16 %v252_v17 }
   0x6   :  { %8 = vsyncpa [#allocation4], 0  ;;  %v293_v22 = vpack.c.bf16 %v115_v10, %v114_v9  ;;  %v226_v23 = vunpack.c.l.bf16 %v249_v15  ;;  %v253_v24 = vld [vmem:[%s438_s0 + $0x30] sm:$0xff]   ;;  %v55_v25 = vsel %vm54_vm2, %v218_v11, 0.0  ;;  %v56_v26 = vsel %vm54_vm2, %v219_v12, 0.0  ;;  %v117_v28 = vld [vmem:[%s439_s1 + $0x38] sm:$0xff] }
   0x7   :  { %v116_v27 = vld [vmem:[%s439_s1 + $0x30] sm:$0xff]  ;;  %v250_v29 = vld [vmem:[%s438_s0 + $0x18] sm:$0xff]   ;;  %v239_v30 = vunpack.c.h.bf16 %v252_v17  ;;  %v57_v31 = vadd.f32 %v56_v26, %v55_v25  ;;  %v58_v32 = vsel %vm54_vm2, %v222_v14, 0.0  ;;  %v227_v33 = vunpack.c.h.bf16 %v249_v15  ;;  %v118_v59 = vld [vmem:[%s439_s1 + $0x40] sm:$0xff]  ;;  %s329_s19 = smov [#allocation3]  }
   0x8   :  { %291 = vmatpush3.bf16.msra.mxu0 %v290_v8  ;;  %v60_v34 = vsel %vm54_vm2, %v223_v18, 0.0  ;;  %v76_v35 = vsel %vm54_vm2, %v234_v19, 0.0  ;;  %v242_v36 = vunpack.c.l.bf16 %v253_v24  ;;  %v77_v38 = vsel %vm54_vm2, %v235_v20, 0.0  ;;  %v254_v42 = vld [vmem:[%s438_s0 + $0x38] sm:$0xff]   ;;  %v21_v16 = vld [vmem:[#allocation2] sm:$0x3] }
   0x9   :  { %292 = vmatprep.subr.bf16.mxu0 %v326_v3  ;;  %v59_v37 = vadd.f32 %v58_v32, %v57_v31  ;;  %v79_v39 = vsel %vm54_vm2, %v238_v21, 0.0  ;;  %v296_v40 = vpack.c.bf16 %v117_v28, %v116_v27  ;;  %v230_v41 = vunpack.c.l.bf16 %v250_v29  ;;  %s206_s20 = sshll.u32 %s329_s19, 4  ;;  %s207_s20 = int_to_ptr.vmem [resolvable:$true] %s206_s20 }
   0xa   :  { %v62_v43 = vsel %vm54_vm2, %v226_v23, 0.0  ;;  %v78_v44 = vadd.f32 %v77_v38, %v76_v35  ;;  %v243_v45 = vunpack.c.h.bf16 %v253_v24  ;;  %v81_v47 = vsel %vm54_vm2, %v239_v30, 0.0  ;;  %s302_s21 = scalar_lea.vmem %s207_s20, 32  ;;  %p307_p1 = scmp.lt.s32.totalorder %s207_s20, %s207_s20 }
   0xb   :  { %v61_v46 = vadd.f32 %v60_v34, %v59_v37  ;;  %v231_v48 = vunpack.c.h.bf16 %v250_v29  ;;  %v64_v49 = vsel %vm54_vm2, %v227_v33, 0.0  ;;  %v246_v51 = vunpack.c.l.bf16 %v254_v42  ;;  %p303_p0 = scmp.ne.s32.totalorder %s207_s20, %s302_s21  ;;  %p308_p2 = scmp.lt.s32.totalorder %s302_s21, %s302_s21 }
   0xc   :  { %294 = vmatpush3.bf16.msra.mxu0 %v293_v22  ;;  %v80_v50 = vadd.f32 %v79_v39, %v78_v44  ;;  %v83_v53 = vsel %vm54_vm2, %v242_v36, 0.0  ;;  %v66_v54 = vsel %vm54_vm2, %v230_v41, 0.0  ;;  %v247_v56 = vunpack.c.h.bf16 %v254_v42  ;;  %v214_v22 = vld [vmem:[%s440_s2] ss:$0 sm:$0xff] }
   0xd   :  { %295 = vmatprep.subr.bf16.mxu0 %v326_v3  ;;  %v63_v52 = vadd.f32 %v62_v43, %v61_v46  ;;  %v85_v58 = vsel %vm54_vm2, %v243_v45, 0.0  ;;  %v68_v60 = vsel %vm54_vm2, %v231_v48, 0.0  ;;  %v87_v63 = vsel %vm54_vm2, %v246_v51, 0.0  ;;  %p309_p3 = por %p308_p2, %p307_p1 }
   0xe   :  { %v82_v55 = vadd.f32 %v81_v47, %v80_v50  ;;  %v89_v2 = vsel %vm54_vm2, %v247_v56, 0.0  ;;  %vm99_vm3 = vcmask 1041409  }
   0xf   :  { %v65_v57 = vadd.f32 %v64_v49, %v63_v52  ;;  %p310_p4 = pnand %p309_p3, %p303_p0 }
  0x10   :  { %297 = vmatpush3.bf16.msra.mxu0 %v296_v40  ;;  %v84_v61 = vadd.f32 %v83_v53, %v82_v55 }
  0x11   :  { %281 = vmatprep.subr.mxu0 %v327_v6  ;;  %v67_v62 = vadd.f32 %v66_v54, %v65_v57 }
  0x12   :  { %v86_v0 = vadd.f32 %v85_v58, %v84_v61 }
  0x13   :  { %v69_v1 = vadd.f32 %v68_v60, %v67_v62 }
  0x14   :  { %282 = vmatpush3.msra.mxu0 %v118_v59  ;;  %v88_v3 = vadd.f32 %v87_v63, %v86_v0 }
  0x15   :  { %v70_v4 = vrot.slane %v69_v1, 4 }
  0x16   :  { %v90_v5 = vadd.f32 %v89_v2, %v88_v3 }
  0x17   :  { %v71_v7 = vadd.f32 %v70_v4, %v69_v1 }
  0x18   :  { %v91_v6 = vrot.slane %v90_v5, 4 }
  0x19   :  { %v72_v8 = vrot.slane %v71_v7, 2 }
  0x1a   :  { %v92_v9 = vadd.f32 %v91_v6, %v90_v5 }
  0x1b   :  { %v73_v10 = vadd.f32 %v72_v8, %v71_v7 }
  0x1c   :  { %v93_v11 = vrot.slane %v92_v9, 2 }
  0x1d   :  { %v74_v12 = vrot.slane %v73_v10, 1 }
  0x1e   :  { %v94_v13 = vadd.f32 %v93_v11, %v92_v9 }
  0x1f   :  { %v75_v14 = vadd.f32 %v74_v12, %v73_v10 }
  0x20   :  { %v95_v15 = vrot.slane %v94_v13, 1 }
  0x22   :  { %v96_v17 = vadd.f32 %v95_v15, %v94_v13 }
  0x24   :  { %v100_v18 = vsel %vm99_vm3, %v96_v17, %v75_v14 }
  0x25   :  { %v102_v19 = vadd.f32 %v100_v18, %v21_v16 }
  0x27   :  { %104 = vst.msk [vmem:[#allocation2] sm:$0x3] %vm19_vm0, %v102_v19 }
  0x2e   :  { %v108_v20 = vld [vmem:[#allocation2] sm:$0x3] }
  0x2f   :  { %v109_v21 = vmul.f32 0.015625, %v108_v20 }
  0x31   :  { %284 = vmatmul.mubr.msk.f32.vlgmr.msra.gmra.mrb[0].mxu0 %vm54_vm2, %v109_v21 }
 0x104   :  { %v195_v23 = vpop.f32.mrb[0].mxu0 }
 0x105   :  { %v196_v24 = vadd.f32 %v214_v22, %v195_v23  ;;  %v285_v25 = vpop.f32.mrb[1].mxu0 }
 0x107   :  { %199 = vst [vmem:[#allocation3] sm:$0x3] %v196_v24 }
 0x108   :  { %313 = shalt.err (!%p310_p4)
}
 0x109   :  { %s314_s24 = scalar_lea.hbm %s441_s3, 32 }
 0x10a   :  { %p315_p5 = scmp.ne.s32.totalorder %s441_s3, %s314_s24  ;;  %p318_p6 = scmp.lt.u32.totalorder %s314_s24, %s441_s3 }
 0x10c   :  { %p320_p7 = pnand %p318_p6, %p315_p5 }
 0x10e   :  { %323 = shalt.err (!%p320_p7)
}
 0x10f   :  { %209 = dma.vmem_to_hbm [thread:$0]  %s207_s20, 32, %s441_s3, [#allocation4]  }
 0x110   :  { %324 = dma.done.wait [#allocation4], 32  }
 0x111   :  { %325 = vsyncadd [#allocation4], 4294967264 }
 0x112   :  { %213 = vsyncpa [#allocation4], 1 }

</bundles_post_ra>
